<compile_context>
chip_gen: v7x
topology: tpu7x:2x2x1
jax: 0.10.0
libtpu: 0.0.40
codegen_flags: <defaults>
</compile_context>

<pallas_src>
import math
from typing import NamedTuple

import jax
import jax.numpy as jnp
from jax.experimental import pallas as pl
from jax.experimental.pallas import tpu as pltpu

_LANE = 128


def _round_up(v, m):
    return (v + m - 1) // m * m


# --------------------------------------------------------------------------- #
# One-time preparation (hoisted out of the per-call forward path)
# --------------------------------------------------------------------------- #
class GCNPrepared(NamedTuple):
    adj: jax.Array   # (N_p, N_p) bf16, zero-padded
    w1: jax.Array    # (F_in_p, F_hid_p) bf16
    b1: jax.Array    # (1, F_hid_p) f32
    w2: jax.Array    # (F_hid_p, F_out_p) bf16
    b2: jax.Array    # (1, F_out_p) f32
    n: int
    f_in: int
    f_out: int


def prepare_gcn(adj, params):
    """Pad to 128-lane multiples and cast to MXU-native bf16 ONCE (not per call)."""
    w1, b1, w2, b2 = params
    n = adj.shape[0]
    f_in, f_hid = w1.shape
    f_out = w2.shape[1]
    n_p = _round_up(n, _LANE)
    f_in_p = _round_up(f_in, _LANE)
    f_hid_p = _round_up(f_hid, _LANE)
    f_out_p = _round_up(f_out, _LANE)
    # Zero padding keeps the math exact: padded adj columns are zero, so padded
    # h rows (= relu(b1)) never contribute to real output rows; padded feature
    # columns multiply zero weight rows.
    adj_p = jnp.pad(adj, ((0, n_p - n), (0, n_p - n))).astype(jnp.bfloat16)
    w1_p = jnp.pad(w1, ((0, f_in_p - f_in), (0, f_hid_p - f_hid))).astype(jnp.bfloat16)
    b1_p = jnp.pad(b1, (0, f_hid_p - f_hid)).reshape(1, f_hid_p).astype(jnp.float32)
    w2_p = jnp.pad(w2, ((0, f_hid_p - f_hid), (0, f_out_p - f_out))).astype(jnp.bfloat16)
    b2_p = jnp.pad(b2, (0, f_out_p - f_out)).reshape(1, f_out_p).astype(jnp.float32)
    return GCNPrepared(adj_p, w1_p, b1_p, w2_p, b2_p, n, f_in, f_out)


# --------------------------------------------------------------------------- #
# Hardware queries / budgets
# --------------------------------------------------------------------------- #
def _vmem_capacity_bytes():
    try:
        return int(pltpu.get_tpu_info().vmem_capacity_bytes)
    except Exception:
        return 64 << 20  # conservative (v7x per-TensorCore)


def _resident_vmem_bytes(n_p, f_in_p, f_hid_p, f_out_p):
    """Footprint of the fused VMEM-resident path (operands + scratch + temps)."""
    bf, f32 = 2, 4
    adj = n_p * n_p * bf                       # resident adj scratch
    x = n_p * f_in_p * bf
    w = (f_in_p * f_hid_p + f_hid_p * f_out_p) * bf
    b = (f_hid_p + f_out_p) * f32
    h = n_p * f_hid_p * bf                     # resident hidden activation
    out = n_p * f_out_p * f32
    temps = n_p * (f_hid_p + 2 * f_out_p) * f32  # s1 / s2 / y f32 intermediates
    return adj + x + w + b + h + out + temps


def _pick_tiles(n_p):
    """Generation-specific row/K tiles for the tiled fallback path."""
    try:
        kind = jax.devices()[0].device_kind.lower()
    except Exception:
        kind = ""
    is_v5e = ("v5e" in kind) or ("v5 lite" in kind) or ("v5litepod" in kind)
    tm = 128 if is_v5e else 256   # v6e/v7x MXU is 2x256x256; v5e is 4x128x128
    tk = 512 if is_v5e else 256   # bigger K chunks on v5e amortize per-step overhead
    while n_p % tm:
        tm //= 2
    while n_p % tk:
        tk //= 2
    return max(tm, 8), max(tk, 128)


# --------------------------------------------------------------------------- #
# Fused VMEM-resident path (adj streamed once, layer-1 overlapped with its DMA)
# --------------------------------------------------------------------------- #
def _make_resident_kernel(num_chunks, chunk_rows, lookahead=2):
    def kernel(x_ref, adj_hbm, w1_ref, b1_ref, w2_ref, b2_ref, o_ref,
               adj_vmem, h_vmem, sem):
        def adj_copy(c):
            rows = pl.ds(c * chunk_rows, chunk_rows)
            return pltpu.make_async_copy(adj_hbm.at[rows, :],
                                         adj_vmem.at[rows, :], sem.at[c])

        # Kick off the first adj row-chunk DMAs.
        for c in range(min(lookahead, num_chunks)):
            adj_copy(c).start()

        # Layer-1 support overlaps with the adj stream (no dependence on adj).
        s1 = jnp.dot(x_ref[...], w1_ref[...],
                     preferred_element_type=jnp.float32).astype(jnp.bfloat16)

        # Layer 1: h = relu(adj @ s1 + b1), computed chunk-by-chunk as adj lands.
        for c in range(num_chunks):
            adj_copy(c).wait()
            if c + lookahead < num_chunks:
                adj_copy(c + lookahead).start()
            rows = pl.ds(c * chunk_rows, chunk_rows)
            h = jnp.dot(adj_vmem[rows, :], s1, preferred_element_type=jnp.float32)
            h = jnp.maximum(h + b1_ref[...], 0.0)          # f32 VPU epilogue
            h_vmem[rows, :] = h.astype(h_vmem.dtype)

        # dropout(p=0) is the identity -> nothing to do.

        # Layer 2 from the now fully VMEM-resident adj and h (adj read once).
        s2 = jnp.dot(h_vmem[...], w2_ref[...],
                     preferred_element_type=jnp.float32).astype(jnp.bfloat16)
        y = jnp.dot(adj_vmem[...], s2, preferred_element_type=jnp.float32)
        o_ref[...] = (y + b2_ref[...]).astype(o_ref.dtype)  # lane-dense store
    return kernel


def _forward_resident(x_p, prep, need_bytes, cap_bytes):
    n_p = prep.adj.shape[0]
    f_hid_p = prep.w1.shape[1]
    f_out_p = prep.w2.shape[1]

    chunk = 512
    while n_p % chunk:
        chunk //= 2
    chunk = min(chunk, n_p)
    num_chunks = n_p // chunk

    # Explicit VMEM budget sized from the operand footprint (capped at capacity).
    vmem_limit = int(min(cap_bytes, max(32 << 20, 2 * need_bytes + (8 << 20))))

    vmem_spec = pl.BlockSpec(memory_space=pltpu.MemorySpace.VMEM)
    return pl.pallas_call(
        _make_resident_kernel(num_chunks, chunk),
        out_shape=jax.ShapeDtypeStruct((n_p, f_out_p), jnp.float32),
        in_specs=[vmem_spec,                              # x
                  pl.BlockSpec(memory_space=pl.ANY),      # adj stays in HBM; manual DMA
                  vmem_spec, vmem_spec,                   # w1, b1
                  vmem_spec, vmem_spec],                  # w2, b2
        out_specs=vmem_spec,
        scratch_shapes=[
            pltpu.VMEM((n_p, n_p), jnp.bfloat16),         # resident adj copy
            pltpu.VMEM((n_p, f_hid_p), jnp.bfloat16),     # resident hidden activation
            pltpu.SemaphoreType.DMA((num_chunks,)),
        ],
        compiler_params=pltpu.CompilerParams(vmem_limit_bytes=vmem_limit),
    )(x_p, prep.adj, prep.w1, prep.b1, prep.w2, prep.b2)


# --------------------------------------------------------------------------- #
# Row-tiled fallback path (large graphs / v7x-sized VMEM), parallel row axis
# --------------------------------------------------------------------------- #
def _support_kernel(x_ref, w_ref, o_ref):
    o_ref[...] = jnp.dot(x_ref[...], w_ref[...],
                         preferred_element_type=jnp.float32).astype(o_ref.dtype)


def _support_matmul(x, w, tm):
    n_p, f_in_p = x.shape
    f_out_p = w.shape[1]
    return pl.pallas_call(
        _support_kernel,
        out_shape=jax.ShapeDtypeStruct((n_p, f_out_p), jnp.bfloat16),
        grid=(n_p // tm,),
        in_specs=[pl.BlockSpec((tm, f_in_p), lambda i: (i, 0)),
                  pl.BlockSpec((f_in_p, f_out_p), lambda i: (0, 0))],
        out_specs=pl.BlockSpec((tm, f_out_p), lambda i: (i, 0)),
        compiler_params=pltpu.CompilerParams(dimension_semantics=("parallel",)),
    )(x, w)


def _make_spmm_kernel(apply_relu):
    def kernel(adj_ref, s_ref, b_ref, o_ref, acc_ref):
        k = pl.program_id(1)

        @pl.when(k == 0)
        def _():
            acc_ref[...] = jnp.zeros_like(acc_ref)

        acc_ref[...] += jnp.dot(adj_ref[...], s_ref[...],
                                preferred_element_type=jnp.float32)

        @pl.when(k == pl.num_programs(1) - 1)
        def _():
            y = acc_ref[...] + b_ref[...]
            if apply_relu:
                y = jnp.maximum(y, 0.0)
            o_ref[...] = y.astype(o_ref.dtype)
    return kernel


def _adj_spmm(adj, s, b, apply_relu, out_dtype, tm, tk):
    n_p = adj.shape[0]
    f_p = s.shape[1]
    return pl.pallas_call(
        _make_spmm_kernel(apply_relu),
        out_shape=jax.ShapeDtypeStruct((n_p, f_p), out_dtype),
        grid=(n_p // tm, n_p // tk),
        in_specs=[pl.BlockSpec((tm, tk), lambda i, k: (i, k)),
                  pl.BlockSpec((tk, f_p), lambda i, k: (k, 0)),
                  pl.BlockSpec((1, f_p), lambda i, k: (0, 0))],
        out_specs=pl.BlockSpec((tm, f_p), lambda i, k: (i, 0)),
        scratch_shapes=[pltpu.VMEM((tm, f_p), jnp.float32)],
        compiler_params=pltpu.CompilerParams(
            dimension_semantics=("parallel", "arbitrary")),
    )(adj, s, b)


def _forward_tiled(x_p, prep):
    n_p = prep.adj.shape[0]
    tm, tk = _pick_tiles(n_p)
    s1 = _support_matmul(x_p, prep.w1, tm)                               # x @ W1
    h = _adj_spmm(prep.adj, s1, prep.b1, True, jnp.bfloat16, tm, tk)     # relu(adj@s1+b1)
    s2 = _support_matmul(h, prep.w2, tm)                                 # h @ W2
    return _adj_spmm(prep.adj, s2, prep.b2, False, jnp.float32, tm, tk)  # adj@s2+b2


# --------------------------------------------------------------------------- #
# Public forward
# --------------------------------------------------------------------------- #
def gcn_forward(x, prepared: GCNPrepared, dropout_p=0.0, force_tiled=False):
    """GCN forward (eval mode). Returns f32 (N, F_out)."""
    if dropout_p != 0.0:
        # TODO(synk): training-mode dropout via pltpu.prng_seed/prng_random_bits.
        raise NotImplementedError("dropout_p > 0 not implemented (module default p=0)")
    n, f_in = x.shape
    assert n == prepared.n and f_in == prepared.f_in

    n_p = prepared.adj.shape[0]
    f_in_p, f_hid_p = prepared.w1.shape
    f_out_p = prepared.w2.shape[1]
    x_p = jnp.pad(x, ((0, n_p - n), (0, f_in_p - f_in))).astype(jnp.bfloat16)

    need = _resident_vmem_bytes(n_p, f_in_p, f_hid_p, f_out_p)
    cap = _vmem_capacity_bytes()
    fits = (need + need // 4 + (8 << 20)) <= cap   # generation-aware (v7x = 64 MiB)

    if fits and not force_tiled:
        y_p = _forward_resident(x_p, prepared, need, cap)
    else:
        y_p = _forward_tiled(x_p, prepared)
    return y_p[:prepared.n, :prepared.f_out]


def init_gcn_params(key, in_features, hidden_features, out_features):
    """Matches GraphConvolution.reset_parameters: U(-1/sqrt(out), 1/sqrt(out))."""
    k1, k2, k3, k4 = jax.random.split(key, 4)
    stdv1 = 1.0 / math.sqrt(hidden_features)
    stdv2 = 1.0 / math.sqrt(out_features)
    w1 = jax.random.uniform(k1, (in_features, hidden_features), jnp.float32,
                            minval=-stdv1, maxval=stdv1)
    b1 = jax.random.uniform(k2, (hidden_features,), jnp.float32,
                            minval=-stdv1, maxval=stdv1)
    w2 = jax.random.uniform(k3, (hidden_features, out_features), jnp.float32,
                            minval=-stdv2, maxval=stdv2)
    b2 = jax.random.uniform(k4, (out_features,), jnp.float32,
                            minval=-stdv2, maxval=stdv2)
    return (w1, b1, w2, b2)


if __name__ == "__main__":
    key = jax.random.PRNGKey(0)
    k_x, k_adj, k_p = jax.random.split(key, 3)

    # Small graph: N nodes, modest feature dims (N and features padded to 128 lanes).
    N, F_IN, F_HID, F_OUT = 64, 32, 64, 16

    x = jax.random.normal(k_x, (N, F_IN), jnp.float32)

    # Symmetric, row-normalized dense adjacency (spmm with dense adj == mm).
    a = (jax.random.uniform(k_adj, (N, N)) < 0.1).astype(jnp.float32)
    a = jnp.maximum(a, a.T) + jnp.eye(N, dtype=jnp.float32)
    adj = a / jnp.sum(a, axis=1, keepdims=True)

    params = init_gcn_params(k_p, F_IN, F_HID, F_OUT)

    # One-time pad + bf16 cast (hoisted out of the forward path).
    prepared = prepare_gcn(adj, params)

    # Fused VMEM-resident path (auto-selected at this size).
    out = gcn_forward(x, prepared)
    jax.block_until_ready(out)

    # Also exercise the row-tiled fallback path so it stays tested.
    out_tiled = gcn_forward(x, prepared, force_tiled=True)
    jax.block_until_ready(out_tiled)

    # Sanity check against plain-JAX f32 reference (bf16 MXU operands -> loose tol).
    w1, b1, w2, b2 = params
    h_ref = jnp.maximum(adj @ (x @ w1) + b1, 0.0)
    y_ref = adj @ (h_ref @ w2) + b2
    assert out.shape == (N, F_OUT)
    err_r = float(jnp.max(jnp.abs(out - y_ref)))
    err_t = float(jnp.max(jnp.abs(out_tiled - y_ref)))
    assert jnp.allclose(out, y_ref, atol=3e-2, rtol=3e-2), err_r
    assert jnp.allclose(out_tiled, y_ref, atol=3e-2, rtol=3e-2), err_t

    print("KERNEL_OK")
</pallas_src>

<mosaic_0001>
module attributes {stable_mosaic.version = 11 : i64} {
  func.func @kernel(%arg0: memref<128x128xbf16, #tpu.memory_space<vmem>>, %arg1: memref<128x128xbf16, #tpu.memory_space<any>>, %arg2: memref<128x128xbf16, #tpu.memory_space<vmem>>, %arg3: memref<1x128xf32, #tpu.memory_space<vmem>>, %arg4: memref<128x128xbf16, #tpu.memory_space<vmem>>, %arg5: memref<1x128xf32, #tpu.memory_space<vmem>>, %arg6: memref<128x128xf32, #tpu.memory_space<vmem>>, %arg7: memref<128x128xbf16, #tpu.memory_space<vmem>>, %arg8: memref<128x128xbf16, #tpu.memory_space<vmem>>, %arg9: memref<1x!tpu.dma_semaphore, #tpu.memory_space<semaphore_mem>>) attributes {dimension_semantics = [], scalar_prefetch = 0 : i64, scratch_operands = 3 : i64, tpu.core_type = #tpu.core_type<tc>} {
    %c0_i32 = arith.constant 0 : i32
    %c0_i32_0 = arith.constant 0 : i32
    %c0_i32_1 = arith.constant 0 : i32
    %0 = tpu.memref_slice %arg1[%c0_i32_0, %c0_i32_1] : memref<128x128xbf16, #tpu.memory_space<any>> -> memref<128x128xbf16, #tpu.memory_space<any>>
    %c0_i32_2 = arith.constant 0 : i32
    %c0_i32_3 = arith.constant 0 : i32
    %1 = tpu.memref_slice %arg7[%c0_i32_2, %c0_i32_3] : memref<128x128xbf16, #tpu.memory_space<vmem>> -> memref<128x128xbf16, #tpu.memory_space<vmem>>
    %2 = tpu.memref_slice %arg9[%c0_i32] : memref<1x!tpu.dma_semaphore, #tpu.memory_space<semaphore_mem>> -> memref<1x!tpu.dma_semaphore, #tpu.memory_space<semaphore_mem>>
    %3 = tpu.memref_squeeze %2 : memref<1x!tpu.dma_semaphore, #tpu.memory_space<semaphore_mem>> -> memref<!tpu.dma_semaphore, #tpu.memory_space<semaphore_mem>>
    tpu.enqueue_dma source(%0 : memref<128x128xbf16, #tpu.memory_space<any>>) target(%1 : memref<128x128xbf16, #tpu.memory_space<vmem>>) target_semaphore(%3 : memref<!tpu.dma_semaphore, #tpu.memory_space<semaphore_mem>>)
    %c0 = arith.constant 0 : index
    %c0_4 = arith.constant 0 : index
    %4 = vector.load %arg0[%c0, %c0_4] : memref<128x128xbf16, #tpu.memory_space<vmem>>, vector<128x128xbf16>
    %c0_5 = arith.constant 0 : index
    %c0_6 = arith.constant 0 : index
    %5 = vector.load %arg2[%c0_5, %c0_6] : memref<128x128xbf16, #tpu.memory_space<vmem>>, vector<128x128xbf16>
    %cst = arith.constant dense<0.000000e+00> : vector<128x128xf32>
    %6 = tpu.matmul %4, %5, %cst {dimension_numbers = #tpu.dot_dimension_numbers<[1], [0], [0], [1], [0, 0, 1, 1], [], []>} : vector<128x128xbf16>, vector<128x128xbf16>, vector<128x128xf32> -> vector<128x128xf32>
    %7 = arith.truncf %6 : vector<128x128xf32> to vector<128x128xbf16>
    %c0_i32_7 = arith.constant 0 : i32
    %c0_i32_8 = arith.constant 0 : i32
    %c0_i32_9 = arith.constant 0 : i32
    %8 = tpu.memref_slice %arg1[%c0_i32_8, %c0_i32_9] : memref<128x128xbf16, #tpu.memory_space<any>> -> memref<128x128xbf16, #tpu.memory_space<any>>
    %c0_i32_10 = arith.constant 0 : i32
    %c0_i32_11 = arith.constant 0 : i32
    %9 = tpu.memref_slice %arg7[%c0_i32_10, %c0_i32_11] : memref<128x128xbf16, #tpu.memory_space<vmem>> -> memref<128x128xbf16, #tpu.memory_space<vmem>>
    %10 = tpu.memref_slice %arg9[%c0_i32_7] : memref<1x!tpu.dma_semaphore, #tpu.memory_space<semaphore_mem>> -> memref<1x!tpu.dma_semaphore, #tpu.memory_space<semaphore_mem>>
    %11 = tpu.memref_squeeze %10 : memref<1x!tpu.dma_semaphore, #tpu.memory_space<semaphore_mem>> -> memref<!tpu.dma_semaphore, #tpu.memory_space<semaphore_mem>>
    tpu.wait_dma2 semaphore(%11 : memref<!tpu.dma_semaphore, #tpu.memory_space<semaphore_mem>>) src(%8 : memref<128x128xbf16, #tpu.memory_space<any>>) dst(%9 : memref<128x128xbf16, #tpu.memory_space<vmem>>)
    %c0_12 = arith.constant 0 : index
    %c0_13 = arith.constant 0 : index
    %12 = vector.load %arg7[%c0_12, %c0_13] : memref<128x128xbf16, #tpu.memory_space<vmem>>, vector<128x128xbf16>
    %cst_14 = arith.constant dense<0.000000e+00> : vector<128x128xf32>
    %13 = tpu.matmul %12, %7, %cst_14 {dimension_numbers = #tpu.dot_dimension_numbers<[1], [0], [0], [1], [0, 0, 1, 1], [], []>} : vector<128x128xbf16>, vector<128x128xbf16>, vector<128x128xf32> -> vector<128x128xf32>
    %c0_15 = arith.constant 0 : index
    %c0_16 = arith.constant 0 : index
    %14 = vector.load %arg3[%c0_15, %c0_16] : memref<1x128xf32, #tpu.memory_space<vmem>>, vector<1x128xf32>
    %15 = vector.broadcast %14 : vector<1x128xf32> to vector<128x128xf32>
    %16 = arith.addf %13, %15 : vector<128x128xf32>
    %cst_17 = arith.constant 0.000000e+00 : f32
    %17 = vector.broadcast %cst_17 : f32 to vector<128x128xf32>
    %18 = arith.maximumf %16, %17 : vector<128x128xf32>
    %19 = arith.truncf %18 : vector<128x128xf32> to vector<128x128xbf16>
    %c0_18 = arith.constant 0 : index
    %c0_19 = arith.constant 0 : index
    %20 = vector.load %arg8[%c0_18, %c0_19] : memref<128x128xbf16, #tpu.memory_space<vmem>>, vector<128x128xbf16>
    tpu.vector_store %arg8[%c0_18, %c0_19], %19 {strides = array<i32>} : memref<128x128xbf16, #tpu.memory_space<vmem>>, vector<128x128xbf16>,
    %c0_20 = arith.constant 0 : index
    %c0_21 = arith.constant 0 : index
    %21 = vector.load %arg8[%c0_20, %c0_21] : memref<128x128xbf16, #tpu.memory_space<vmem>>, vector<128x128xbf16>
    %c0_22 = arith.constant 0 : index
    %c0_23 = arith.constant 0 : index
    %22 = vector.load %arg4[%c0_22, %c0_23] : memref<128x128xbf16, #tpu.memory_space<vmem>>, vector<128x128xbf16>
    %cst_24 = arith.constant dense<0.000000e+00> : vector<128x128xf32>
    %23 = tpu.matmul %21, %22, %cst_24 {dimension_numbers = #tpu.dot_dimension_numbers<[1], [0], [0], [1], [0, 0, 1, 1], [], []>} : vector<128x128xbf16>, vector<128x128xbf16>, vector<128x128xf32> -> vector<128x128xf32>
    %24 = arith.truncf %23 : vector<128x128xf32> to vector<128x128xbf16>
    %c0_25 = arith.constant 0 : index
    %c0_26 = arith.constant 0 : index
    %25 = vector.load %arg7[%c0_25, %c0_26] : memref<128x128xbf16, #tpu.memory_space<vmem>>, vector<128x128xbf16>
    %cst_27 = arith.constant dense<0.000000e+00> : vector<128x128xf32>
    %26 = tpu.matmul %25, %24, %cst_27 {dimension_numbers = #tpu.dot_dimension_numbers<[1], [0], [0], [1], [0, 0, 1, 1], [], []>} : vector<128x128xbf16>, vector<128x128xbf16>, vector<128x128xf32> -> vector<128x128xf32>
    %c0_28 = arith.constant 0 : index
    %c0_29 = arith.constant 0 : index
    %27 = vector.load %arg5[%c0_28, %c0_29] : memref<1x128xf32, #tpu.memory_space<vmem>>, vector<1x128xf32>
    %28 = vector.broadcast %27 : vector<1x128xf32> to vector<128x128xf32>
    %29 = arith.addf %26, %28 : vector<128x128xf32>
    %c0_30 = arith.constant 0 : index
    %c0_31 = arith.constant 0 : index
    %30 = vector.load %arg6[%c0_30, %c0_31] : memref<128x128xf32, #tpu.memory_space<vmem>>, vector<128x128xf32>
    tpu.vector_store %arg6[%c0_30, %c0_31], %29 {strides = array<i32>} : memref<128x128xf32, #tpu.memory_space<vmem>>, vector<128x128xf32>,
    return
  }
}

</mosaic_0001>

<bundles_post_ra>
// kernel: tpu_custom_call.1
= control target key start
LH: loop header
LB: loop body
LE: loop exit
PB: predicated region body
PF: predicated region fallthrough
CT: control target
= control target key end

     0   :  { %11 = vsyncpa [#allocation6], 0  ;;  %s1309_s0 = inlined_call_operand.hbm [shape: bf16[128,128], index: 0, kind: input, shape index: {}]   ;;  %s1310_s1 = inlined_call_operand.hbm [shape: bf16[128,128], index: 1, kind: input, shape index: {}]   ;;  %s1311_s2 = inlined_call_operand.hbm [shape: bf16[128,128], index: 2, kind: input, shape index: {}]   ;;  %s1312_s3 = inlined_call_operand.vmem [shape: f32[1,128], index: 3, kind: input, shape index: {}]   ;;  %s1313_s4 = inlined_call_operand.hbm [shape: bf16[128,128], index: 4, kind: input, shape index: {}]   ;;  %s1314_s5 = inlined_call_operand.vmem [shape: f32[1,128], index: 5, kind: input, shape index: {}]   ;;  %s1315_s6 = inlined_call_operand.hbm [shape: f32[128,128], index: 6, kind: output, shape index: {}]  }
   0x1   :  { %12 = vsyncpa [#allocation9], 0 }
   0x2   :  { %13 = vsyncpa [#allocation7], 0  ;;  %s1155_s21 = smov [#allocation8]   ;;  %s1156_s23 = smov [#allocation5]  }
   0x3   :  { %s31_s22 = sshll.u32 %s1155_s21, 4  ;;  %s19_s24 = sshll.u32 %s1156_s23, 4  ;;  %s32_s22 = int_to_ptr.vmem [resolvable:$true] %s31_s22  ;;  %s1199_s24 = int_to_ptr.vmem [resolvable:$true] %s19_s24 }
   0x4   :  { %s1037_s27 = scalar_lea.hbm %s1311_s2, 1024 }
   0x5   :  { %p1038_p0 = scmp.ne.s32.totalorder %s1311_s2, %s1037_s27  ;;  %p1041_p1 = scmp.lt.u32.totalorder %s1037_s27, %s1311_s2 }
   0x7   :  { %p1043_p2 = pnand %p1041_p1, %p1038_p0 }
   0x9   :  { %1046 = shalt.err (!%p1043_p2)
}
   0xa   :  { %s1047_s8 = scalar_lea.vmem %s32_s22, 1024  ;;  %p1052_p4 = scmp.lt.s32.totalorder %s32_s22, %s32_s22 }
   0xb   :  { %p1048_p3 = scmp.ne.s32.totalorder %s32_s22, %s1047_s8  ;;  %p1053_p5 = scmp.lt.s32.totalorder %s1047_s8, %s1047_s8 }
   0xd   :  { %p1054_p6 = por %p1053_p5, %p1052_p4 }
   0xf   :  { %p1055_p7 = pnand %p1054_p6, %p1048_p3 }
  0x11   :  { %1058 = shalt.err (!%p1055_p7)
}
  0x12   :  { %s1157_s9 = smov 64   ;;  %s1158_s10 = smov 4  }
  0x13   :  { %37 = dma.hbm_to_vmem [thread:$0]  %s1311_s2, 1024, %s32_s22, [#allocation9], %s1157_s9, %s1157_s9, %s1158_s10  }
  0x14   :  { %s1059_s15 = scalar_lea.hbm %s1309_s0, 1024 }
  0x15   :  { %p1060_p8 = scmp.ne.s32.totalorder %s1309_s0, %s1059_s15  ;;  %p1063_p9 = scmp.lt.u32.totalorder %s1059_s15, %s1309_s0 }
  0x17   :  { %p1065_p10 = pnand %p1063_p9, %p1060_p8 }
  0x19   :  { %1068 = shalt.err (!%p1065_p10)
}
  0x1a   :  { %s1069_s20 = scalar_lea.vmem %s1199_s24, 1024  ;;  %p1074_p12 = scmp.lt.s32.totalorder %s1199_s24, %s1199_s24 }
  0x1b   :  { %p1070_p11 = scmp.ne.s32.totalorder %s1199_s24, %s1069_s20  ;;  %p1075_p13 = scmp.lt.s32.totalorder %s1069_s20, %s1069_s20 }
  0x1d   :  { %p1076_p0 = por %p1075_p13, %p1074_p12 }
  0x1f   :  { %p1077_p1 = pnand %p1076_p0, %p1070_p11 }
  0x21   :  { %1080 = shalt.err (!%p1077_p1)
}
  0x22   :  { %25 = dma.hbm_to_vmem [thread:$0]  %s1309_s0, 1024, %s1199_s24, [#allocation6], %s1157_s9, %s1157_s9, %s1158_s10  }
  0x23   :  { %s1159_s22 = smov [#allocation10]   ;;  %s1081_s27 = scalar_lea.hbm %s1313_s4, 1024 }
  0x24   :  { %s45_s23 = sshll.u32 %s1159_s22, 4  ;;  %p1082_p2 = scmp.ne.s32.totalorder %s1313_s4, %s1081_s27  ;;  %s46_s23 = int_to_ptr.vmem [resolvable:$true] %s45_s23 }
  0x25   :  { %p1085_p3 = scmp.lt.u32.totalorder %s1081_s27, %s1313_s4 }
  0x27   :  { %p1087_p4 = pnand %p1085_p3, %p1082_p2 }
  0x29   :  { %1090 = shalt.err (!%p1087_p4)
}
  0x2a   :  { %s1091_s8 = scalar_lea.vmem %s46_s23, 1024  ;;  %p1096_p6 = scmp.lt.s32.totalorder %s46_s23, %s46_s23 }
  0x2b   :  { %p1092_p5 = scmp.ne.s32.totalorder %s46_s23, %s1091_s8  ;;  %p1097_p7 = scmp.lt.s32.totalorder %s1091_s8, %s1091_s8 }
  0x2d   :  { %p1098_p8 = por %p1097_p7, %p1096_p6 }
  0x2f   :  { %p1099_p9 = pnand %p1098_p8, %p1092_p5 }
  0x31   :  { %1102 = shalt.err (!%p1099_p9)
}
  0x32   :  { %51 = dma.hbm_to_vmem [thread:$0]  %s1313_s4, 1024, %s46_s23, [#allocation9], %s1157_s9, %s1157_s9, %s1158_s10  }
  0x33   :  { %1147 = dma.done.wait [#allocation6], 1024  }
  0x34   :  { %1148 = vsyncadd [#allocation6], 4294966272 }
  0x35   :  { %1149 = dma.done.wait [#allocation9], 2048  }
  0x36   :  { %1150 = vsyncadd [#allocation9], 4294965248  ;;  %v1013_v0 = vld [vmem:[#allocation8] sm:$0xff]   ;;  %v1014_v1 = vld [vmem:[#allocation8 + $0x8] sm:$0xff]   ;;  %s1160_s4 = smov [#allocation2]   ;;  %s1103_s12 = scalar_lea.hbm %s1310_s1, 1024 }
  0x37   :  { %876 = vmatprep.subr.bf16.mxu0 %v1013_v0  ;;  %v1015_v2 = vld [vmem:[#allocation8 + $0x10] sm:$0xff]   ;;  %v1016_v3 = vld [vmem:[#allocation8 + $0x18] sm:$0xff]   ;;  %v1021_v4 = vld [vmem:[#allocation5] sm:$0xff]   ;;  %s71_s9 = sshll.u32 %s1160_s4, 4  ;;  %p1104_p10 = scmp.ne.s32.totalorder %s1310_s1, %s1103_s12  ;;  %s72_s9 = int_to_ptr.vmem [resolvable:$true] %s71_s9 }
  0x38   :  { %877 = vmatpush3.bf16.msra.mxu0 %v1013_v0  ;;  %892 = vmatprep.mubr.bf16.mxu0 %v1021_v4  ;;  %v1017_v5 = vld [vmem:[#allocation8 + $0x20] sm:$0xff]   ;;  %v1018_v6 = vld [vmem:[#allocation8 + $0x28] sm:$0xff]   ;;  %v1019_v7 = vld [vmem:[#allocation8 + $0x30] sm:$0xff]   ;;  %p1107_p11 = scmp.lt.u32.totalorder %s1103_s12, %s1310_s1 }
  0x39   :  { %878 = vmatprep.subr.bf16.mxu0 %v1014_v1  ;;  %v1020_v8 = vld [vmem:[#allocation8 + $0x38] sm:$0xff]   ;;  %v1022_v9 = vld [vmem:[#allocation5 + $0x8] sm:$0xff]   ;;  %v1023_v10 = vld [vmem:[#allocation5 + $0x10] sm:$0xff]  }
  0x3a   :  { %v1024_v11 = vld [vmem:[#allocation5 + $0x18] sm:$0xff]   ;;  %v1025_v12 = vld [vmem:[#allocation5 + $0x20] sm:$0xff]   ;;  %v1026_v13 = vld [vmem:[#allocation5 + $0x28] sm:$0xff]   ;;  %p1109_p12 = pnand %p1107_p11, %p1104_p10 }
  0x3b   :  { %v1027_v14 = vld [vmem:[#allocation5 + $0x30] sm:$0xff]   ;;  %v1028_v15 = vld [vmem:[#allocation5 + $0x38] sm:$0xff]  }
  0x3c   :  { %879 = vmatpush3.bf16.msra.mxu0 %v1014_v1 }
  0x3d   :  { %880 = vmatprep.subr.bf16.mxu0 %v1015_v2 }
  0x40   :  { %881 = vmatpush3.bf16.msra.mxu0 %v1015_v2 }
  0x41   :  { %882 = vmatprep.subr.bf16.mxu0 %v1016_v3 }
  0x44   :  { %883 = vmatpush3.bf16.msra.mxu0 %v1016_v3 }
  0x45   :  { %884 = vmatprep.subr.bf16.mxu0 %v1017_v5 }
  0x48   :  { %885 = vmatpush3.bf16.msra.mxu0 %v1017_v5 }
  0x49   :  { %886 = vmatprep.subr.bf16.mxu0 %v1018_v6 }
  0x4c   :  { %887 = vmatpush3.bf16.msra.mxu0 %v1018_v6 }
  0x4d   :  { %888 = vmatprep.subr.bf16.mxu0 %v1019_v7 }
  0x50   :  { %889 = vmatpush3.bf16.msra.mxu0 %v1019_v7 }
  0x51   :  { %890 = vmatprep.subr.bf16.mxu0 %v1020_v8 }
  0x54   :  { %891 = vmatpush3.bf16.msra.mxu0 %v1020_v8 }
  0x57   :  { %893 = vmatmul.mubr.bf16.vlgmr.msra.gmra.mrb[0].mxu0 %v1022_v9 }
  0x58   :  { %896 = vmatprep.mubr.bf16.mxu0 %v1023_v10 }
  0x5f   :  { %897 = vmatmul.mubr.bf16.gmra.mrb[4].mxu0 %v1024_v11 }
  0x60   :  { %900 = vmatprep.mubr.bf16.mxu0 %v1025_v12 }
  0x67   :  { %901 = vmatmul.mubr.bf16.gmra.mrb[8].mxu0 %v1026_v13 }
  0x68   :  { %904 = vmatprep.mubr.bf16.mxu0 %v1027_v14 }
  0x6f   :  { %905 = vmatmul.mubr.bf16.gmra.mrb[12].mxu0 %v1028_v15 }
  0x70   :  { %1112 = shalt.err (!%p1109_p12)  }
  0x71   :  { %s1113_s17 = scalar_lea.vmem %s72_s9, 1024  ;;  %p1118_p0 = scmp.lt.s32.totalorder %s72_s9, %s72_s9 }
  0x72   :  { %p1114_p13 = scmp.ne.s32.totalorder %s72_s9, %s1113_s17  ;;  %p1119_p1 = scmp.lt.s32.totalorder %s1113_s17, %s1113_s17 }
  0x74   :  { %p1120_p2 = por %p1119_p1, %p1118_p0 }
  0x76   :  { %p1121_p3 = pnand %p1120_p2, %p1114_p13 }
  0x78   :  { %1124 = shalt.err (!%p1121_p3)  }
  0x79   :  { %74 = dma.hbm_to_vmem [thread:$0]  %s1310_s1, 1024, %s72_s9, [#allocation4] }
 0x12a   :  { %v894_v16 = vpop.f32.mrb[0].mxu0 }
 0x12b   :  { %v237_v17 = vpop.f32.mrb[1].mxu0 }
 0x12c   :  { %v895_v18 = vpop.f32.mrb[2].mxu0 }
 0x12d   :  { %v301_v19 = vpack.c.bf16 %v895_v18, %v894_v16  ;;  %v240_v20 = vpop.f32.mrb[3].mxu0 }
 0x12e   :  { %v300_v21 = vpack.c.bf16 %v240_v20, %v237_v17 }
 0x130   :  { %908 = vmatprep.subr.bf16.mxu1 %v300_v21 }
 0x132   :  { %v898_v22 = vpop.f32.mrb[4].mxu0 }
 0x133   :  { %v253_v23 = vpop.f32.mrb[5].mxu0 }
 0x134   :  { %v899_v24 = vpop.f32.mrb[6].mxu0 }
 0x135   :  { %v303_v25 = vpack.c.bf16 %v899_v24, %v898_v22  ;;  %v256_v26 = vpop.f32.mrb[7].mxu0 }
 0x136   :  { %v302_v27 = vpack.c.bf16 %v256_v26, %v253_v23 }
 0x13a   :  { %v902_v28 = vpop.f32.mrb[8].mxu0 }
 0x13b   :  { %v269_v29 = vpop.f32.mrb[9].mxu0 }
 0x13c   :  { %v903_v30 = vpop.f32.mrb[10].mxu0 }
 0x13d   :  { %v305_v31 = vpack.c.bf16 %v903_v30, %v902_v28  ;;  %v272_v32 = vpop.f32.mrb[11].mxu0 }
 0x13e   :  { %v304_v33 = vpack.c.bf16 %v272_v32, %v269_v29 }
 0x142   :  { %v906_v34 = vpop.f32.mrb[12].mxu0 }
 0x143   :  { %v285_v35 = vpop.f32.mrb[13].mxu0 }
 0x144   :  { %v907_v36 = vpop.f32.mrb[14].mxu0 }
 0x145   :  { %v307_v37 = vpack.c.bf16 %v907_v36, %v906_v34  ;;  %v288_v38 = vpop.f32.mrb[15].mxu0 }
 0x146   :  { %v306_v39 = vpack.c.bf16 %v288_v38, %v285_v35 }
 0x147   :  { %1151 = dma.done.wait [#allocation4], 1024 }
 0x148   :  { %1152 = vsyncadd [#allocation4], 4294966272  ;;  %909 = vmatpush3.bf16.msra.mxu1 %v300_v21  ;;  %v312_v40 = vld [vmem:[#allocation2] sm:$0xff]  ;;  %v1030_v42 = vld [vmem:[#allocation10 + $0x8] sm:$0xff]  }
 0x149   :  { %910 = vmatprep.subr.bf16.mxu1 %v301_v19  ;;  %924 = vmatprep.mubr.bf16.mxu1 %v312_v40  ;;  %v1029_v41 = vld [vmem:[#allocation10] sm:$0xff]   ;;  %v1031_v43 = vld [vmem:[#allocation10 + $0x10] sm:$0xff]   ;;  %v1032_v44 = vld [vmem:[#allocation10 + $0x18] sm:$0xff]  }
 0x14a   :  { %940 = vmatprep.subr.bf16.mxu0 %v1029_v41  ;;  %v1033_v45 = vld [vmem:[#allocation10 + $0x20] sm:$0xff]   ;;  %v1034_v46 = vld [vmem:[#allocation10 + $0x28] sm:$0xff]   ;;  %v1265_v48 = vld [vmem:[#allocation2 + $0x10] sm:$0xff] }
 0x14b   :  { %941 = vmatpush3.bf16.msra.mxu0 %v1029_v41  ;;  %v1263_v47 = vld [vmem:[#allocation2 + $0x8] sm:$0xff]  ;;  %v1269_v49 = vld [vmem:[#allocation2 + $0x18] sm:$0xff]  ;;  %v1271_v50 = vld [vmem:[#allocation2 + $0x20] sm:$0xff] }
 0x14c   :  { %911 = vmatpush3.bf16.msra.mxu1 %v301_v19  ;;  %942 = vmatprep.subr.bf16.mxu0 %v1030_v42  ;;  %v1275_v51 = vld [vmem:[#allocation2 + $0x28] sm:$0xff]  ;;  %v1277_v52 = vld [vmem:[#allocation2 + $0x30] sm:$0xff]  ;;  %v1281_v53 = vld [vmem:[#allocation2 + $0x38] sm:$0xff] }
 0x14d   :  { %912 = vmatprep.subr.bf16.mxu1 %v302_v27  ;;  %v1035_v54 = vld [vmem:[#allocation10 + $0x30] sm:$0xff]   ;;  %v1036_v55 = vld [vmem:[#allocation10 + $0x38] sm:$0xff]   ;;  %v801_v56 = vld [vmem:[%s1312_s3] ss:$0 sm:$0xff] }
 0x14f   :  { %943 = vmatpush3.bf16.msra.mxu0 %v1030_v42 }
 0x150   :  { %913 = vmatpush3.bf16.msra.mxu1 %v302_v27  ;;  %944 = vmatprep.subr.bf16.mxu0 %v1031_v43 }
 0x151   :  { %914 = vmatprep.subr.bf16.mxu1 %v303_v25 }
 0x153   :  { %945 = vmatpush3.bf16.msra.mxu0 %v1031_v43 }
 0x154   :  { %915 = vmatpush3.bf16.msra.mxu1 %v303_v25  ;;  %946 = vmatprep.subr.bf16.mxu0 %v1032_v44 }
 0x155   :  { %916 = vmatprep.subr.bf16.mxu1 %v304_v33 }
 0x157   :  { %947 = vmatpush3.bf16.msra.mxu0 %v1032_v44 }
 0x158   :  { %917 = vmatpush3.bf16.msra.mxu1 %v304_v33  ;;  %948 = vmatprep.subr.bf16.mxu0 %v1033_v45 }
 0x159   :  { %918 = vmatprep.subr.bf16.mxu1 %v305_v31 }
 0x15b   :  { %949 = vmatpush3.bf16.msra.mxu0 %v1033_v45 }
 0x15c   :  { %919 = vmatpush3.bf16.msra.mxu1 %v305_v31  ;;  %950 = vmatprep.subr.bf16.mxu0 %v1034_v46 }
 0x15d   :  { %920 = vmatprep.subr.bf16.mxu1 %v306_v39 }
 0x15f   :  { %951 = vmatpush3.bf16.msra.mxu0 %v1034_v46 }
 0x160   :  { %921 = vmatpush3.bf16.msra.mxu1 %v306_v39  ;;  %952 = vmatprep.subr.bf16.mxu0 %v1035_v54 }
 0x161   :  { %922 = vmatprep.subr.bf16.mxu1 %v307_v37 }
 0x163   :  { %953 = vmatpush3.bf16.msra.mxu0 %v1035_v54 }
 0x164   :  { %923 = vmatpush3.bf16.msra.mxu1 %v307_v37  ;;  %954 = vmatprep.subr.bf16.mxu0 %v1036_v55 }
 0x167   :  { %925 = vmatmul.mubr.bf16.vlgmr.msra.gmra.mrb[0].mxu1 %v1263_v47  ;;  %955 = vmatpush3.bf16.msra.mxu0 %v1036_v55 }
 0x168   :  { %928 = vmatprep.mubr.bf16.mxu1 %v1265_v48 }
 0x16f   :  { %929 = vmatmul.mubr.bf16.gmra.mrb[4].mxu1 %v1269_v49 }
 0x170   :  { %932 = vmatprep.mubr.bf16.mxu1 %v1271_v50 }
 0x177   :  { %933 = vmatmul.mubr.bf16.gmra.mrb[8].mxu1 %v1275_v51 }
 0x178   :  { %936 = vmatprep.mubr.bf16.mxu1 %v1277_v52 }
 0x17f   :  { %937 = vmatmul.mubr.bf16.gmra.mrb[12].mxu1 %v1281_v53 }
 0x180   :  { %988 = vmatprep.mubr.bf16.mxu1 %v312_v40 }
 0x23a   :  { %v926_v57 = vpop.f32.mrb[0].mxu1 }
 0x23b   :  { %v370_v58 = vadd.f32 %v926_v57, %v801_v56  ;;  %v361_v59 = vpop.f32.mrb[1].mxu1 }
 0x23c   :  { %v362_v60 = vadd.f32 %v801_v56, %v361_v59  ;;  %v927_v61 = vpop.f32.mrb[2].mxu1 }
 0x23d   :  { %v373_v62 = vadd.f32 %v927_v61, %v801_v56  ;;  %v364_v63 = vpop.f32.mrb[3].mxu1  ;;  %v426_v1 = vmax.f32 %v370_v58, 0.0 }
 0x23e   :  { %v365_v0 = vadd.f32 %v801_v56, %v364_v63  ;;  %v424_v3 = vmax.f32 %v362_v60, 0.0 }
 0x23f   :  { %v427_v2 = vmax.f32 %v373_v62, 0.0 }
 0x240   :  { %v425_v4 = vmax.f32 %v365_v0, 0.0 }
 0x241   :  { %v441_v5 = vpack.c.bf16 %v427_v2, %v426_v1 }
 0x242   :  { %v930_v6 = vpop.f32.mrb[4].mxu1  ;;  %v440_v7 = vpack.c.bf16 %v425_v4, %v424_v3 }
 0x243   :  { %v386_v8 = vadd.f32 %v930_v6, %v801_v56  ;;  %v377_v9 = vpop.f32.mrb[5].mxu1 }
 0x244   :  { %v378_v10 = vadd.f32 %v801_v56, %v377_v9  ;;  %v931_v11 = vpop.f32.mrb[6].mxu1  ;;  %956 = vmatprep.mubr.bf16.mxu0 %v440_v7 }
 0x245   :  { %v389_v12 = vadd.f32 %v931_v11, %v801_v56  ;;  %v380_v13 = vpop.f32.mrb[7].mxu1  ;;  %957 = vmatmul.mubr.bf16.vlgmr.msra.gmra.mrb[16].mxu0 %v441_v5  ;;  %v430_v15 = vmax.f32 %v386_v8, 0.0 }
 0x246   :  { %v381_v14 = vadd.f32 %v801_v56, %v380_v13  ;;  %v428_v17 = vmax.f32 %v378_v10, 0.0 }
 0x247   :  { %v431_v16 = vmax.f32 %v389_v12, 0.0 }
 0x248   :  { %v429_v18 = vmax.f32 %v381_v14, 0.0 }
 0x249   :  { %v443_v19 = vpack.c.bf16 %v431_v16, %v430_v15  ;;  %v810_v16 = vld [vmem:[%s1314_s5] ss:$0 sm:$0xff]  ;;  %s1161_s5 = smov [#allocation11]  }
 0x24a   :  { %v442_v20 = vpack.c.bf16 %v429_v18, %v428_v17  ;;  %v934_v21 = vpop.f32.mrb[8].mxu1  ;;  %s766_s21 = sshll.u32 %s1161_s5, 4  ;;  %s767_s21 = int_to_ptr.vmem [resolvable:$true] %s766_s21 }
 0x24b   :  { %v402_v22 = vadd.f32 %v934_v21, %v801_v56  ;;  %v393_v23 = vpop.f32.mrb[9].mxu1  ;;  %s1125_s22 = scalar_lea.vmem %s767_s21, 2048  ;;  %p1130_p5 = scmp.lt.s32.totalorder %s767_s21, %s767_s21 }
 0x24c   :  { %v394_v24 = vadd.f32 %v801_v56, %v393_v23  ;;  %v935_v25 = vpop.f32.mrb[10].mxu1  ;;  %960 = vmatprep.mubr.bf16.mxu0 %v442_v20  ;;  %p1126_p4 = scmp.ne.s32.totalorder %s767_s21, %s1125_s22  ;;  %p1131_p6 = scmp.lt.s32.totalorder %s1125_s22, %s1125_s22 }
 0x24d   :  { %v405_v26 = vadd.f32 %v935_v25, %v801_v56  ;;  %v396_v27 = vpop.f32.mrb[11].mxu1  ;;  %961 = vmatmul.mubr.bf16.gmra.mrb[20].mxu0 %v443_v19  ;;  %v434_v29 = vmax.f32 %v402_v22, 0.0 }
 0x24e   :  { %v397_v28 = vadd.f32 %v801_v56, %v396_v27  ;;  %v432_v31 = vmax.f32 %v394_v24, 0.0  ;;  %p1132_p7 = por %p1131_p6, %p1130_p5 }
 0x24f   :  { %v435_v30 = vmax.f32 %v405_v26, 0.0 }
 0x250   :  { %v433_v32 = vmax.f32 %v397_v28, 0.0  ;;  %p1133_p8 = pnand %p1132_p7, %p1126_p4 }
 0x251   :  { %v445_v33 = vpack.c.bf16 %v435_v30, %v434_v29 }
 0x252   :  { %v444_v34 = vpack.c.bf16 %v433_v32, %v432_v31  ;;  %v938_v35 = vpop.f32.mrb[12].mxu1 }
 0x253   :  { %v418_v36 = vadd.f32 %v938_v35, %v801_v56  ;;  %v409_v37 = vpop.f32.mrb[13].mxu1 }
 0x254   :  { %v410_v38 = vadd.f32 %v801_v56, %v409_v37  ;;  %v939_v39 = vpop.f32.mrb[14].mxu1  ;;  %964 = vmatprep.mubr.bf16.mxu0 %v444_v34 }
 0x255   :  { %v421_v40 = vadd.f32 %v939_v39, %v801_v56  ;;  %v412_v41 = vpop.f32.mrb[15].mxu1  ;;  %965 = vmatmul.mubr.bf16.gmra.mrb[24].mxu0 %v445_v33  ;;  %v438_v43 = vmax.f32 %v418_v36, 0.0 }
 0x256   :  { %v413_v42 = vadd.f32 %v801_v56, %v412_v41  ;;  %v436_v45 = vmax.f32 %v410_v38, 0.0 }
 0x257   :  { %v439_v44 = vmax.f32 %v421_v40, 0.0 }
 0x258   :  { %v437_v46 = vmax.f32 %v413_v42, 0.0 }
 0x259   :  { %v447_v54 = vpack.c.bf16 %v439_v44, %v438_v43 }
 0x25a   :  { %v446_v55 = vpack.c.bf16 %v437_v46, %v436_v45 }
 0x25c   :  { %968 = vmatprep.mubr.bf16.mxu0 %v446_v55 }
 0x25d   :  { %969 = vmatmul.mubr.bf16.gmra.mrb[28].mxu0 %v447_v54 }
 0x318   :  { %v958_v57 = vpop.f32.mrb[16].mxu0 }
 0x319   :  { %v562_v58 = vpop.f32.mrb[17].mxu0 }
 0x31a   :  { %v959_v59 = vpop.f32.mrb[18].mxu0 }
 0x31b   :  { %v626_v60 = vpack.c.bf16 %v959_v59, %v958_v57  ;;  %v565_v61 = vpop.f32.mrb[19].mxu0 }
 0x31c   :  { %v625_v62 = vpack.c.bf16 %v565_v61, %v562_v58 }
 0x31e   :  { %972 = vmatprep.subr.bf16.mxu1 %v625_v62 }
 0x31f   :  { %973 = vmatpush3.bf16.msra.mxu1 %v625_v62 }
 0x320   :  { %v962_v63 = vpop.f32.mrb[20].mxu0  ;;  %974 = vmatprep.subr.bf16.mxu1 %v626_v60 }
 0x321   :  { %v578_v0 = vpop.f32.mrb[21].mxu0 }
 0x322   :  { %v963_v56 = vpop.f32.mrb[22].mxu0 }
 0x323   :  { %v628_v1 = vpack.c.bf16 %v963_v56, %v962_v63  ;;  %v581_v2 = vpop.f32.mrb[23].mxu0  ;;  %975 = vmatpush3.bf16.msra.mxu1 %v626_v60 }
 0x324   :  { %v627_v3 = vpack.c.bf16 %v581_v2, %v578_v0 }
 0x326   :  { %976 = vmatprep.subr.bf16.mxu1 %v627_v3 }
 0x327   :  { %977 = vmatpush3.bf16.msra.mxu1 %v627_v3 }
 0x328   :  { %v966_v4 = vpop.f32.mrb[24].mxu0  ;;  %978 = vmatprep.subr.bf16.mxu1 %v628_v1 }
 0x329   :  { %v594_v5 = vpop.f32.mrb[25].mxu0 }
 0x32a   :  { %v967_v6 = vpop.f32.mrb[26].mxu0 }
 0x32b   :  { %v630_v7 = vpack.c.bf16 %v967_v6, %v966_v4  ;;  %v597_v8 = vpop.f32.mrb[27].mxu0  ;;  %979 = vmatpush3.bf16.msra.mxu1 %v628_v1 }
 0x32c   :  { %v629_v9 = vpack.c.bf16 %v597_v8, %v594_v5 }
 0x32e   :  { %980 = vmatprep.subr.bf16.mxu1 %v629_v9 }
 0x32f   :  { %981 = vmatpush3.bf16.msra.mxu1 %v629_v9 }
 0x330   :  { %v970_v10 = vpop.f32.mrb[28].mxu0  ;;  %982 = vmatprep.subr.bf16.mxu1 %v630_v7 }
 0x331   :  { %v610_v11 = vpop.f32.mrb[29].mxu0 }
 0x332   :  { %v971_v12 = vpop.f32.mrb[30].mxu0 }
 0x333   :  { %v632_v13 = vpack.c.bf16 %v971_v12, %v970_v10  ;;  %v613_v14 = vpop.f32.mrb[31].mxu0  ;;  %983 = vmatpush3.bf16.msra.mxu1 %v630_v7 }
 0x334   :  { %v631_v15 = vpack.c.bf16 %v613_v14, %v610_v11 }
 0x336   :  { %984 = vmatprep.subr.bf16.mxu1 %v631_v15 }
 0x337   :  { %985 = vmatpush3.bf16.msra.mxu1 %v631_v15 }
 0x338   :  { %986 = vmatprep.subr.bf16.mxu1 %v632_v13 }
 0x33b   :  { %987 = vmatpush3.bf16.msra.mxu1 %v632_v13 }
 0x33e   :  { %989 = vmatmul.mubr.bf16.vlgmr.msra.gmra.mrb[16].mxu1 %v1263_v47 }
 0x33f   :  { %992 = vmatprep.mubr.bf16.mxu1 %v1265_v48 }
 0x346   :  { %993 = vmatmul.mubr.bf16.gmra.mrb[20].mxu1 %v1269_v49 }
 0x347   :  { %996 = vmatprep.mubr.bf16.mxu1 %v1271_v50 }
 0x34e   :  { %997 = vmatmul.mubr.bf16.gmra.mrb[24].mxu1 %v1275_v51 }
 0x34f   :  { %1000 = vmatprep.mubr.bf16.mxu1 %v1277_v52 }
 0x356   :  { %1001 = vmatmul.mubr.bf16.gmra.mrb[28].mxu1 %v1281_v53 }
 0x411   :  { %v990_v17 = vpop.f32.mrb[16].mxu1 }
 0x412   :  { %v691_v18 = vadd.f32 %v990_v17, %v810_v16  ;;  %v682_v19 = vpop.f32.mrb[17].mxu1 }
 0x413   :  { %v683_v47 = vadd.f32 %v810_v16, %v682_v19  ;;  %v991_v20 = vpop.f32.mrb[18].mxu1 }
 0x414   :  { %747 = vst [vmem:[#allocation11 + $0x10] sm:$0xff] %v691_v18  ;;  %v694_v48 = vadd.f32 %v991_v20, %v810_v16  ;;  %v685_v49 = vpop.f32.mrb[19].mxu1 }
 0x415   :  { %745 = vst [vmem:[#allocation11] sm:$0xff] %v683_v47  ;;  %v686_v50 = vadd.f32 %v810_v16, %v685_v49 }
 0x416   :  { %748 = vst [vmem:[#allocation11 + $0x18] sm:$0xff] %v694_v48 }
 0x417   :  { %746 = vst [vmem:[#allocation11 + $0x8] sm:$0xff] %v686_v50 }
 0x419   :  { %v994_v51 = vpop.f32.mrb[20].mxu1 }
 0x41a   :  { %v707_v52 = vadd.f32 %v994_v51, %v810_v16  ;;  %v698_v21 = vpop.f32.mrb[21].mxu1 }
 0x41b   :  { %v699_v53 = vadd.f32 %v810_v16, %v698_v21  ;;  %v995_v22 = vpop.f32.mrb[22].mxu1 }
 0x41c   :  { %751 = vst [vmem:[#allocation11 + $0x30] sm:$0xff] %v707_v52  ;;  %v710_v23 = vadd.f32 %v995_v22, %v810_v16  ;;  %v701_v24 = vpop.f32.mrb[23].mxu1 }
 0x41d   :  { %749 = vst [vmem:[#allocation11 + $0x20] sm:$0xff] %v699_v53  ;;  %v702_v25 = vadd.f32 %v810_v16, %v701_v24 }
 0x41e   :  { %752 = vst [vmem:[#allocation11 + $0x38] sm:$0xff] %v710_v23 }
 0x41f   :  { %750 = vst [vmem:[#allocation11 + $0x28] sm:$0xff] %v702_v25 }
 0x421   :  { %v998_v26 = vpop.f32.mrb[24].mxu1 }
 0x422   :  { %v723_v27 = vadd.f32 %v998_v26, %v810_v16  ;;  %v714_v28 = vpop.f32.mrb[25].mxu1 }
 0x423   :  { %v715_v29 = vadd.f32 %v810_v16, %v714_v28  ;;  %v999_v30 = vpop.f32.mrb[26].mxu1 }
 0x424   :  { %755 = vst [vmem:[#allocation11 + $0x50] sm:$0xff] %v723_v27  ;;  %v726_v31 = vadd.f32 %v999_v30, %v810_v16  ;;  %v717_v32 = vpop.f32.mrb[27].mxu1 }
 0x425   :  { %753 = vst [vmem:[#allocation11 + $0x40] sm:$0xff] %v715_v29  ;;  %v718_v33 = vadd.f32 %v810_v16, %v717_v32 }
 0x426   :  { %756 = vst [vmem:[#allocation11 + $0x58] sm:$0xff] %v726_v31 }
 0x427   :  { %754 = vst [vmem:[#allocation11 + $0x48] sm:$0xff] %v718_v33 }
 0x429   :  { %v1002_v34 = vpop.f32.mrb[28].mxu1 }
 0x42a   :  { %v739_v35 = vadd.f32 %v1002_v34, %v810_v16  ;;  %v730_v36 = vpop.f32.mrb[29].mxu1 }
 0x42b   :  { %v731_v37 = vadd.f32 %v810_v16, %v730_v36  ;;  %v1003_v38 = vpop.f32.mrb[30].mxu1 }
 0x42c   :  { %759 = vst [vmem:[#allocation11 + $0x70] sm:$0xff] %v739_v35  ;;  %v742_v39 = vadd.f32 %v1003_v38, %v810_v16  ;;  %v733_v40 = vpop.f32.mrb[31].mxu1 }
 0x42d   :  { %757 = vst [vmem:[#allocation11 + $0x60] sm:$0xff] %v731_v37  ;;  %v734_v41 = vadd.f32 %v810_v16, %v733_v40 }
 0x42e   :  { %760 = vst [vmem:[#allocation11 + $0x78] sm:$0xff] %v742_v39 }
 0x42f   :  { %758 = vst [vmem:[#allocation11 + $0x68] sm:$0xff] %v734_v41 }
 0x430   :  { %1136 = shalt.err (!%p1133_p8)
}
 0x431   :  { %s1137_s26 = scalar_lea.hbm %s1315_s6, 2048 }
 0x432   :  { %p1138_p9 = scmp.ne.s32.totalorder %s1315_s6, %s1137_s26  ;;  %p1141_p10 = scmp.lt.u32.totalorder %s1137_s26, %s1315_s6 }
 0x434   :  { %p1143_p11 = pnand %p1141_p10, %p1138_p9 }
 0x436   :  { %1146 = shalt.err (!%p1143_p11)
}
 0x437   :  { %s1162_s7 = smov 128   ;;  %s1163_s8 = smov 8  }
 0x438   :  { %772 = dma.vmem_to_hbm [thread:$0]  %s767_s21, 2048, %s1315_s6, [#allocation7], %s1162_s7, %s1162_s7, %s1163_s8  }
 0x439   :  { %1153 = dma.done.wait [#allocation7], 2048  }
 0x43a   :  { %1154 = vsyncadd [#allocation7], 4294965248 }
 0x43b   :  { %776 = vsyncpa [#allocation6], 1 }
 0x43c   :  { %777 = vsyncpa [#allocation9], 1 }
 0x43d   :  { %778 = vsyncpa [#allocation7], 1 }
 0x43e   :  { %779 = vsyncmov [#allocation4] }
 0x441   :  { %s780_s4 = vpop.sfrf %779 }
 0x442   :  { %p811_p12 = scmp.ne.s32.totalorder %s780_s4, 0 }
 0x444   :  { %784 = shalt.err (%p811_p12)  }

</bundles_post_ra>
